<compile_context>
chip_gen: v7x
topology: tpu7x:2x2x1
jax: 0.10.0
libtpu: 0.0.40
codegen_flags: <defaults>
</compile_context>

<pallas_src>
import jax
import jax.numpy as jnp
from jax.experimental import pallas as pl
from jax.experimental.pallas import tpu as pltpu


def _cdiv(a: int, b: int) -> int:
    return -(-a // b)


def _squared_relu_kernel(x_ref, o_ref):
    x = x_ref[...]
    r = jnp.maximum(x, 0)
    o_ref[...] = r * r


def _squared_relu_xla(x):
    r = jnp.maximum(x, 0)
    return r * r


def squared_relu(x, *, target_block_bytes=6 * 1024 * 1024, min_pallas_bytes=1 << 20):
    """Elementwise relu(x)^2. Float dtypes only; any shape."""
    if not jnp.issubdtype(x.dtype, jnp.floating):
        raise TypeError(f"squared_relu expects a floating dtype, got {x.dtype}")

    orig_shape = x.shape
    dtype = x.dtype
    n = x.size
    if n == 0:
        return x
    itemsize = dtype.itemsize
    nbytes = n * itemsize

    # --- Lane width: widest multiple of 128 that divides n (reshape only, no copy).
    lanes = None
    for cand in (2048, 1024, 512, 256, 128):
        if n % cand == 0:
            lanes = cand
            break

    # Small or ragged tensors: plain XLA is already roofline-bound for an
    # elementwise op and avoids kernel launch / pad / slice overhead entirely.
    if lanes is None or nbytes < min_pallas_bytes:
        return _squared_relu_xla(x)

    rows = n // lanes
    slab = x.reshape(rows, lanes)

    # Sublane granularity: sub-32-bit dtypes pack 2/4 rows per sublane.
    sub = 8 * max(1, 4 // itemsize)  # 8 (f32), 16 (bf16/f16), 32 (8-bit)

    if rows <= sub:
        # Single block covering the full sublane extent (legal: equals array dim).
        tr = rows
    else:
        # Largest tile (multiple of `sub`) under the per-block byte budget.
        tr_cap = max(sub, (target_block_bytes // (lanes * itemsize)) // sub * sub)
        steps = _cdiv(rows, tr_cap)
        max_steps = _cdiv(rows, sub)
        # Megacore balance + intra-core pipelining: prefer >=4 steps, even count.
        if max_steps >= 4:
            steps = max(steps, 4)
            if steps % 2:
                steps += 1
        steps = min(steps, max_steps)
        # Balanced tiles: equal-size blocks rounded up to sublane granularity
        # (no nearly-empty masked trailing block).
        tr = _cdiv(_cdiv(rows, steps), sub) * sub
        tr = min(tr, rows)

    grid = (_cdiv(rows, tr),)

    out = pl.pallas_call(
        _squared_relu_kernel,
        out_shape=jax.ShapeDtypeStruct((rows, lanes), dtype),
        grid_spec=pltpu.PrefetchScalarGridSpec(
            num_scalar_prefetch=0,
            grid=grid,
            in_specs=[pl.BlockSpec((tr, lanes), lambda i: (i, 0))],
            out_specs=pl.BlockSpec((tr, lanes), lambda i: (i, 0)),
        ),
        compiler_params=pltpu.CompilerParams(
            dimension_semantics=("parallel",),
            # 4 x block (in+out, double-buffered) + slack; safe on v7x's 64 MiB
            # physical VMEM and raises v5e/v6e's default scoped limit.
            vmem_limit_bytes=48 * 1024 * 1024,
        ),
    )(slab)

    return out.reshape(orig_shape)


if __name__ == "__main__":
    key = jax.random.PRNGKey(0)
    # NCHW activation consistent with the module: batch=2, C=4, H=W=16.
    x = jax.random.normal(key, (2, 4, 16, 16), dtype=jnp.float32)

    # Force the Pallas path even at this small size so the kernel is exercised.
    y = squared_relu(x, min_pallas_bytes=0)
    y = jax.block_until_ready(y)

    y_ref = jnp.square(jnp.maximum(x, 0.0))
    assert y.shape == x.shape and y.dtype == x.dtype
    assert jnp.allclose(y, y_ref, atol=1e-6, rtol=1e-6)

    # Larger tensor: default path (multi-step balanced grid through the kernel).
    x2 = jax.random.normal(jax.random.PRNGKey(1), (8, 64, 32, 32), jnp.float32)
    y2 = jax.block_until_ready(squared_relu(x2))
    assert jnp.allclose(y2, jnp.square(jnp.maximum(x2, 0.0)), atol=1e-6, rtol=1e-6)

    # bf16 path (16-row sublane rounding).
    x3 = jax.random.normal(jax.random.PRNGKey(2), (4, 64, 32, 32)).astype(jnp.bfloat16)
    y3 = jax.block_until_ready(squared_relu(x3, min_pallas_bytes=0))
    assert y3.dtype == jnp.bfloat16
    assert jnp.allclose(
        y3.astype(jnp.float32),
        jnp.square(jnp.maximum(x3, 0)).astype(jnp.float32),
        atol=1e-2, rtol=1e-2,
    )

    # Ragged shape: falls back to the XLA elementwise path (no pad/slice).
    x4 = jax.random.normal(jax.random.PRNGKey(3), (3, 5, 7), jnp.float32)
    y4 = jax.block_until_ready(squared_relu(x4))
    assert jnp.allclose(y4, jnp.square(jnp.maximum(x4, 0.0)), atol=1e-6, rtol=1e-6)

    print("KERNEL_OK")
</pallas_src>

<mosaic_0001>
module attributes {stable_mosaic.version = 11 : i64} {
  func.func @_squared_relu_kernel(%arg0: i32, %arg1: memref<1x2048xf32, #tpu.memory_space<vmem>>, %arg2: memref<1x2048xf32, #tpu.memory_space<vmem>>) attributes {dimension_semantics = [#tpu.dimension_semantics<parallel>], iteration_bounds = array<i64: 1>, scalar_prefetch = 0 : i64, scratch_operands = 0 : i64, tpu.core_type = #tpu.core_type<tc>, window_params = [{transform_indices = @transform_0, window_bounds = array<i64: 1, 2048>}, {transform_indices = @transform_1, window_bounds = array<i64: 1, 2048>}]} {
    %c0 = arith.constant 0 : index
    %c0_0 = arith.constant 0 : index
    %0 = vector.load %arg1[%c0, %c0_0] : memref<1x2048xf32, #tpu.memory_space<vmem>>, vector<1x2048xf32>
    %cst = arith.constant 0.000000e+00 : f32
    %1 = vector.broadcast %cst : f32 to vector<1x2048xf32>
    %2 = arith.maximumf %0, %1 : vector<1x2048xf32>
    %3 = arith.mulf %2, %2 : vector<1x2048xf32>
    %c0_1 = arith.constant 0 : index
    %c0_2 = arith.constant 0 : index
    %4 = vector.load %arg2[%c0_1, %c0_2] : memref<1x2048xf32, #tpu.memory_space<vmem>>, vector<1x2048xf32>
    tpu.vector_store %arg2[%c0_1, %c0_2], %3 {strides = array<i32>} : memref<1x2048xf32, #tpu.memory_space<vmem>>, vector<1x2048xf32>,
    return
  }
  func.func @transform_0(%arg0: i32) -> (i32, i32) {
    %c0_i32 = arith.constant 0 : i32
    %c0_i32_0 = arith.constant 0 : i32
    return %arg0, %c0_i32 : i32, i32
  }
  func.func @transform_1(%arg0: i32) -> (i32, i32) {
    %c0_i32 = arith.constant 0 : i32
    %c0_i32_0 = arith.constant 0 : i32
    return %arg0, %c0_i32 : i32, i32
  }
}

</mosaic_0001>

<bundles_post_ra>
// kernel: tpu_custom_call.1
= control target key start
LH: loop header
LB: loop body
LE: loop exit
PB: predicated region body
PF: predicated region fallthrough
CT: control target
= control target key end

     0   :  { %6 = vsyncpa [#allocation3], 0  ;;  %s130_s0 = inlined_call_operand.hbm [shape: f32[1,2048], index: 0, kind: input, shape index: {}]   ;;  %s131_s1 = inlined_call_operand.hbm [shape: f32[1,2048], index: 1, kind: output, shape index: {}]  }
   0x1   :  { %7 = vsyncpa [#allocation4], 0  ;;  %s94_s6 = smov [#allocation2]   ;;  %s46_s10 = scalar_lea.hbm %s130_s0, 256 }
   0x2   :  { %s14_s7 = sshll.u32 %s94_s6, 4  ;;  %p47_p0 = scmp.ne.s32.totalorder %s130_s0, %s46_s10  ;;  %s15_s7 = int_to_ptr.vmem [resolvable:$true] %s14_s7 }
   0x3   :  { %p50_p1 = scmp.lt.u32.totalorder %s46_s10, %s130_s0 }
   0x5   :  { %p52_p2 = pnand %p50_p1, %p47_p0 }
   0x7   :  { %55 = shalt.err (!%p52_p2)
}
   0x8   :  { %s56_s15 = scalar_lea.vmem %s15_s7, 256  ;;  %p61_p4 = scmp.lt.s32.totalorder %s15_s7, %s15_s7 }
   0x9   :  { %p57_p3 = scmp.ne.s32.totalorder %s15_s7, %s56_s15  ;;  %p62_p5 = scmp.lt.s32.totalorder %s56_s15, %s56_s15 }
   0xb   :  { %p63_p6 = por %p62_p5, %p61_p4 }
   0xd   :  { %p64_p7 = pnand %p63_p6, %p57_p3 }
   0xf   :  { %67 = shalt.err (!%p64_p7)
}
  0x10   :  { %17 = dma.hbm_to_vmem [thread:$0]  %s130_s0, 256, %s15_s7, [#allocation3]  }
  0x11   :  { %90 = dma.done.wait [#allocation3], 256  }
  0x12   :  { %91 = vsyncadd [#allocation3], 4294967040  ;;  %v21_v0 = vld [vmem:[#allocation2] sm:$0xff]  ;;  %v22_v1 = vld [vmem:[#allocation2 + $0x8] sm:$0xff]  ;;  %s95_s18 = smov [#allocation5]  }
  0x13   :  { %s35_s19 = sshll.u32 %s95_s18, 4  ;;  %v23_v2 = vmax.f32 %v21_v0, 0.0  ;;  %v24_v3 = vmax.f32 %v22_v1, 0.0  ;;  %s36_s19 = int_to_ptr.vmem [resolvable:$true] %s35_s19 }
  0x14   :  { %s68_s20 = scalar_lea.vmem %s36_s19, 256  ;;  %p73_p9 = scmp.lt.s32.totalorder %s36_s19, %s36_s19 }
  0x15   :  { %v25_v4 = vmul.f32 %v23_v2, %v23_v2  ;;  %v26_v5 = vmul.f32 %v24_v3, %v24_v3  ;;  %p69_p8 = scmp.ne.s32.totalorder %s36_s19, %s68_s20  ;;  %p74_p10 = scmp.lt.s32.totalorder %s68_s20, %s68_s20 }
  0x17   :  { %27 = vst [vmem:[#allocation5] sm:$0xff] %v25_v4  ;;  %28 = vst [vmem:[#allocation5 + $0x8] sm:$0xff] %v26_v5  ;;  %p75_p11 = por %p74_p10, %p73_p9 }
  0x19   :  { %p76_p12 = pnand %p75_p11, %p69_p8 }
  0x1b   :  { %79 = shalt.err (!%p76_p12)
}
  0x1c   :  { %s80_s22 = scalar_lea.hbm %s131_s1, 256 }
  0x1d   :  { %p81_p13 = scmp.ne.s32.totalorder %s131_s1, %s80_s22  ;;  %p84_p0 = scmp.lt.u32.totalorder %s80_s22, %s131_s1 }
  0x1f   :  { %p86_p1 = pnand %p84_p0, %p81_p13 }
  0x21   :  { %89 = shalt.err (!%p86_p1)
}
  0x22   :  { %38 = dma.vmem_to_hbm [thread:$0]  %s36_s19, 256, %s131_s1, [#allocation4]  }
  0x23   :  { %92 = dma.done.wait [#allocation4], 256  }
  0x24   :  { %93 = vsyncadd [#allocation4], 4294967040 }
  0x25   :  { %42 = vsyncpa [#allocation3], 1 }
  0x26   :  { %43 = vsyncpa [#allocation4], 1 }

</bundles_post_ra>
